<compile_context>
chip_gen: v7x
topology: tpu7x:2x2x1
jax: 0.10.0
libtpu: 0.0.40
codegen_flags: <defaults>
</compile_context>

<pallas_src>
import functools

import jax
import jax.numpy as jnp
from jax.experimental import pallas as pl
from jax.experimental.pallas import tpu as pltpu


def _round_up(x, m):
    return ((x + m - 1) // m) * m


def _policy_kernel(num_hidden, n_actions, x_ref, *refs):
    # refs = (w0, b0, w1, b1, ..., w_head, b_head, out_ref)
    out_ref = refs[-1]
    p = refs[:-1]

    # bf16 input rows -> f32 activations; all matmuls run in f32 with f32
    # accumulation (memory-bound kernel: extra MXU passes are free).
    h = x_ref[...].astype(jnp.float32)

    # Hidden layers: Linear + ReLU.
    for i in range(num_hidden):
        w = p[2 * i][...]          # f32 [in, out]
        b = p[2 * i + 1][...]      # f32 [1, out]
        h = jnp.maximum(jnp.dot(h, w, preferred_element_type=jnp.float32) + b, 0.0)

    # Head on a lane-dense, 128-padded slab (in-register only).  Padded logits
    # carry a -1e30 bias so their exp underflows to exactly 0 and the softmax
    # over the real action lanes is unperturbed.
    w_head = p[2 * num_hidden][...]
    b_head = p[2 * num_hidden + 1][...]
    logits = jnp.dot(h, w_head, preferred_element_type=jnp.float32) + b_head

    m = jnp.max(logits, axis=-1, keepdims=True)
    e = jnp.exp(logits - m)
    denom = jnp.sum(e, axis=-1, keepdims=True)
    probs = e * pl.reciprocal(denom, approx=False)

    # Store only the real action lanes -- HBM writeback is (tile, n_actions)
    # f32, never the 128-wide padded slab.
    out_ref[...] = probs[:, :n_actions].astype(out_ref.dtype)


def _pick_batch_tile(batch, block_batch):
    """Return (tile, padded_batch).

    Small batches use a single full-extent tile (always a legal block shape:
    block dims equal to the full array dims), so there is no padding and no
    post-kernel slice.  Otherwise use >= 2 tiles with a multiple-of-16 tile
    size (bf16 sublane packing) so both v7x TensorCores get work.
    """
    block_batch = max(16, (block_batch // 16) * 16)
    n_tiles = max(1, pl.cdiv(batch, block_batch))
    if n_tiles == 1 and batch >= 32:
        n_tiles = 2                       # v7x megacore: don't idle a core
    if n_tiles == 1:
        return batch, batch               # full-dim tile: no pad, no slice
    tb = _round_up(pl.cdiv(batch, n_tiles), 16)
    return tb, _round_up(batch, tb)


def policy_forward(x, params, *, block_batch=4096):
    """params: list of (W, b) with W shaped [in, out]; last pair is the head."""
    batch, in_dim = x.shape
    num_hidden = len(params) - 1
    n_actions = params[-1][0].shape[1]

    # Lane-dense head slab (in-register only, never written to HBM).
    out_pad = _round_up(max(n_actions, 128), 128)

    # Cap the batch tile so f32 activation temporaries stay comfortably inside
    # VMEM even when hidden layers are wide (v7x has only 64 MiB physical).
    widest = max([in_dim, out_pad] + [w.shape[1] for w, _ in params])
    tb_cap = max(256, (16 << 20) // (widest * 4 * 4))
    tb, b_pad = _pick_batch_tile(batch, min(block_batch, tb_cap))
    grid = (b_pad // tb,)

    # Parameters: f32 weights and (1, out) f32 biases; head padded to the
    # 128-lane slab with -1e30 bias on the padded logits.
    flat = []
    for li, (w, b) in enumerate(params):
        w = w.astype(jnp.float32)
        b = b.astype(jnp.float32)
        if li == num_hidden and out_pad != n_actions:
            w = jnp.pad(w, ((0, 0), (0, out_pad - n_actions)))
            b = jnp.pad(b, (0, out_pad - n_actions), constant_values=-1e30)
        flat.append(w)
        flat.append(b.reshape(1, -1))

    # Input rows as bf16 (halves input HBM bytes); pad rows only if needed.
    x_p = x.astype(jnp.bfloat16)
    if b_pad != batch:
        x_p = jnp.pad(x_p, ((0, b_pad - batch), (0, 0)))

    x_spec = pl.BlockSpec((tb, in_dim), lambda i: (i, 0))
    out_spec = pl.BlockSpec((tb, n_actions), lambda i: (i, 0))

    # VMEM budget: single-buffered resident params + double-buffered x/out
    # tiles + ~8 f32 activation temporaries of the widest layer; clamped well
    # under v7x's 64 MiB physical VMEM.
    param_bytes = sum(p.size * p.dtype.itemsize for p in flat)
    act_bytes = 8 * tb * widest * 4
    io_bytes = 2 * (tb * in_dim * 2 + tb * n_actions * 4)
    vmem_limit = int(min(max(param_bytes + act_bytes + io_bytes + (2 << 20),
                             4 << 20), 48 << 20))

    kernel = functools.partial(_policy_kernel, num_hidden, n_actions)

    def call(param_pipeline_mode):
        if param_pipeline_mode is None:
            param_specs = [pl.BlockSpec(p.shape, lambda i: (0, 0)) for p in flat]
        else:
            # Constant index_map => never re-DMA'd; single-buffer them so wide
            # hidden layers still fit v7x's 64 MiB VMEM.
            param_specs = [
                pl.BlockSpec(p.shape, lambda i: (0, 0),
                             pipeline_mode=param_pipeline_mode)
                for p in flat
            ]
        return pl.pallas_call(
            kernel,
            out_shape=jax.ShapeDtypeStruct((b_pad, n_actions), jnp.float32),
            grid=grid,
            in_specs=[x_spec] + param_specs,
            out_specs=out_spec,
            compiler_params=pltpu.CompilerParams(
                dimension_semantics=("parallel",),
                vmem_limit_bytes=vmem_limit,
            ),
        )(x_p, *flat)

    try:
        out = call(pl.Buffered(1))
    except Exception:
        # Fallback for jax versions that reject single-buffered inputs:
        # default double-buffering (negligible at these parameter sizes).
        out = call(None)

    # No lane slice ever needed; row slice only when the batch was padded
    # (and then it only touches (b_pad, n_actions) f32).
    return out if b_pad == batch else out[:batch]


def init_params(key, env_infos, hidden):
    """Deterministic init mirroring nn.Linear shapes (weights stored transposed)."""
    sizes = [env_infos[0]] + list(hidden) + [env_infos[1]]
    params = []
    for i in range(len(sizes) - 1):
        fan_in, fan_out = sizes[i], sizes[i + 1]
        key, kw, kb = jax.random.split(key, 3)
        bound = 1.0 / jnp.sqrt(fan_in)
        w = jax.random.uniform(kw, (fan_in, fan_out), jnp.float32, -bound, bound)
        b = jax.random.uniform(kb, (fan_out,), jnp.float32, -bound, bound)
        params.append((w, b))
    return params


def policy_forward_ref(x, params):
    h = x
    for w, b in params[:-1]:
        h = jnp.maximum(h @ w + b, 0.0)
    w, b = params[-1]
    return jax.nn.softmax(h @ w + b, axis=1)


# TODO(synk): maj() (Adam step + grad clipping), release_clone(), and
# eval_states() (log_softmax gather for training) are host/training utilities
# with no forward-pass Pallas equivalent; only forward() is implemented here.

if __name__ == "__main__":
    # env_infos = (obs_dim, n_actions); hidden layer sizes
    env_infos = (16, 8)
    hidden = [32, 32]

    key = jax.random.PRNGKey(0)
    key, kx1, kx2 = jax.random.split(key, 3)
    params = init_params(key, env_infos, hidden)

    # Small batch: single full-dim tile -> no padding, no post-kernel slice.
    x_small = jax.random.normal(kx1, (4, env_infos[0]), jnp.float32)
    probs_small = jax.block_until_ready(policy_forward(x_small, params))
    ref_small = policy_forward_ref(x_small, params)
    assert probs_small.shape == (4, env_infos[1])
    assert jnp.allclose(probs_small, ref_small, atol=2e-2), "mismatch vs reference"
    assert jnp.allclose(jnp.sum(probs_small, axis=1), 1.0, atol=1e-5)
    assert bool(jnp.all(probs_small >= 0.0))

    # Larger batch: exercises the 2-tile (v7x megacore) + padded-row path.
    x_big = jax.random.normal(kx2, (100, env_infos[0]), jnp.float32)
    probs_big = jax.block_until_ready(policy_forward(x_big, params))
    ref_big = policy_forward_ref(x_big, params)
    assert probs_big.shape == (100, env_infos[1])
    assert jnp.allclose(probs_big, ref_big, atol=2e-2), "mismatch vs reference"
    assert jnp.allclose(jnp.sum(probs_big, axis=1), 1.0, atol=1e-5)
    assert bool(jnp.all(probs_big >= 0.0))

    print("KERNEL_OK")
</pallas_src>

<mosaic_0001>
module attributes {stable_mosaic.version = 11 : i64} {
  func.func @_policy_kernel(%arg0: i32, %arg1: memref<4x16xbf16, #tpu.memory_space<vmem>>, %arg2: memref<16x32xf32, #tpu.memory_space<vmem>>, %arg3: memref<1x32xf32, #tpu.memory_space<vmem>>, %arg4: memref<32x32xf32, #tpu.memory_space<vmem>>, %arg5: memref<1x32xf32, #tpu.memory_space<vmem>>, %arg6: memref<32x128xf32, #tpu.memory_space<vmem>>, %arg7: memref<1x128xf32, #tpu.memory_space<vmem>>, %arg8: memref<4x8xf32, #tpu.memory_space<vmem>>) attributes {dimension_semantics = [#tpu.dimension_semantics<parallel>], iteration_bounds = array<i64: 1>, scalar_prefetch = 0 : i64, scratch_operands = 0 : i64, tpu.core_type = #tpu.core_type<tc>, window_params = [{transform_indices = @transform_0, window_bounds = array<i64: 4, 16>}, {pipeline_mode = #tpu.pipeline_mode<synchronous>, transform_indices = @transform_1, window_bounds = array<i64: 16, 32>}, {pipeline_mode = #tpu.pipeline_mode<synchronous>, transform_indices = @transform_2, window_bounds = array<i64: 1, 32>}, {pipeline_mode = #tpu.pipeline_mode<synchronous>, transform_indices = @transform_3, window_bounds = array<i64: 32, 32>}, {pipeline_mode = #tpu.pipeline_mode<synchronous>, transform_indices = @transform_4, window_bounds = array<i64: 1, 32>}, {pipeline_mode = #tpu.pipeline_mode<synchronous>, transform_indices = @transform_5, window_bounds = array<i64: 32, 128>}, {pipeline_mode = #tpu.pipeline_mode<synchronous>, transform_indices = @transform_6, window_bounds = array<i64: 1, 128>}, {transform_indices = @transform_7, window_bounds = array<i64: 4, 8>}]} {
    %c0 = arith.constant 0 : index
    %c0_0 = arith.constant 0 : index
    %0 = vector.load %arg1[%c0, %c0_0] : memref<4x16xbf16, #tpu.memory_space<vmem>>, vector<4x16xbf16>
    %1 = arith.extf %0 : vector<4x16xbf16> to vector<4x16xf32>
    %c0_1 = arith.constant 0 : index
    %c0_2 = arith.constant 0 : index
    %2 = vector.load %arg2[%c0_1, %c0_2] : memref<16x32xf32, #tpu.memory_space<vmem>>, vector<16x32xf32>
    %c0_3 = arith.constant 0 : index
    %c0_4 = arith.constant 0 : index
    %3 = vector.load %arg3[%c0_3, %c0_4] : memref<1x32xf32, #tpu.memory_space<vmem>>, vector<1x32xf32>
    %cst = arith.constant dense<0.000000e+00> : vector<4x32xf32>
    %4 = tpu.matmul %1, %2, %cst {dimension_numbers = #tpu.dot_dimension_numbers<[1], [0], [0], [1], [0, 0, 1, 1], [], []>} : vector<4x16xf32>, vector<16x32xf32>, vector<4x32xf32> -> vector<4x32xf32>
    %5 = vector.broadcast %3 : vector<1x32xf32> to vector<4x32xf32>
    %6 = arith.addf %4, %5 : vector<4x32xf32>
    %cst_5 = arith.constant 0.000000e+00 : f32
    %7 = vector.broadcast %cst_5 : f32 to vector<4x32xf32>
    %8 = arith.maximumf %6, %7 : vector<4x32xf32>
    %c0_6 = arith.constant 0 : index
    %c0_7 = arith.constant 0 : index
    %9 = vector.load %arg4[%c0_6, %c0_7] : memref<32x32xf32, #tpu.memory_space<vmem>>, vector<32x32xf32>
    %c0_8 = arith.constant 0 : index
    %c0_9 = arith.constant 0 : index
    %10 = vector.load %arg5[%c0_8, %c0_9] : memref<1x32xf32, #tpu.memory_space<vmem>>, vector<1x32xf32>
    %cst_10 = arith.constant dense<0.000000e+00> : vector<4x32xf32>
    %11 = tpu.matmul %8, %9, %cst_10 {dimension_numbers = #tpu.dot_dimension_numbers<[1], [0], [0], [1], [0, 0, 1, 1], [], []>} : vector<4x32xf32>, vector<32x32xf32>, vector<4x32xf32> -> vector<4x32xf32>
    %12 = vector.broadcast %10 : vector<1x32xf32> to vector<4x32xf32>
    %13 = arith.addf %11, %12 : vector<4x32xf32>
    %cst_11 = arith.constant 0.000000e+00 : f32
    %14 = vector.broadcast %cst_11 : f32 to vector<4x32xf32>
    %15 = arith.maximumf %13, %14 : vector<4x32xf32>
    %c0_12 = arith.constant 0 : index
    %c0_13 = arith.constant 0 : index
    %16 = vector.load %arg6[%c0_12, %c0_13] : memref<32x128xf32, #tpu.memory_space<vmem>>, vector<32x128xf32>
    %c0_14 = arith.constant 0 : index
    %c0_15 = arith.constant 0 : index
    %17 = vector.load %arg7[%c0_14, %c0_15] : memref<1x128xf32, #tpu.memory_space<vmem>>, vector<1x128xf32>
    %cst_16 = arith.constant dense<0.000000e+00> : vector<4x128xf32>
    %18 = tpu.matmul %15, %16, %cst_16 {dimension_numbers = #tpu.dot_dimension_numbers<[1], [0], [0], [1], [0, 0, 1, 1], [], []>} : vector<4x32xf32>, vector<32x128xf32>, vector<4x128xf32> -> vector<4x128xf32>
    %19 = vector.broadcast %17 : vector<1x128xf32> to vector<4x128xf32>
    %20 = arith.addf %18, %19 : vector<4x128xf32>
    %cst_17 = arith.constant dense<0xFF800000> : vector<4xf32>
    %21 = vector.multi_reduction <maximumf>, %20, %cst_17 [1] : vector<4x128xf32> to vector<4xf32>
    %22 = vector.shape_cast %21 : vector<4xf32> to vector<4x1xf32>
    %23 = vector.broadcast %22 : vector<4x1xf32> to vector<4x128xf32>
    %24 = arith.subf %20, %23 : vector<4x128xf32>
    %25 = math.exp %24 : vector<4x128xf32>
    %cst_18 = arith.constant dense<0.000000e+00> : vector<4xf32>
    %26 = vector.multi_reduction <add>, %25, %cst_18 [1] : vector<4x128xf32> to vector<4xf32>
    %27 = vector.shape_cast %26 : vector<4xf32> to vector<4x1xf32>
    %28 = tpu.reciprocal %27 : vector<4x1xf32> -> vector<4x1xf32>
    %29 = vector.broadcast %28 : vector<4x1xf32> to vector<4x128xf32>
    %30 = arith.mulf %25, %29 : vector<4x128xf32>
    %31 = vector.extract_strided_slice %30 {offsets = [0, 0], sizes = [4, 8], strides = [1, 1]} : vector<4x128xf32> to vector<4x8xf32>
    %c0_19 = arith.constant 0 : index
    %c0_20 = arith.constant 0 : index
    %32 = vector.load %arg8[%c0_19, %c0_20] : memref<4x8xf32, #tpu.memory_space<vmem>>, vector<4x8xf32>
    tpu.vector_store %arg8[%c0_19, %c0_20], %31 {strides = array<i32>} : memref<4x8xf32, #tpu.memory_space<vmem>>, vector<4x8xf32>,
    return
  }
  func.func @transform_0(%arg0: i32) -> (i32, i32) {
    %c0_i32 = arith.constant 0 : i32
    %c0_i32_0 = arith.constant 0 : i32
    return %arg0, %c0_i32 : i32, i32
  }
  func.func @transform_1(%arg0: i32) -> (i32, i32) {
    %c0_i32 = arith.constant 0 : i32
    %c0_i32_0 = arith.constant 0 : i32
    %c0_i32_1 = arith.constant 0 : i32
    return %c0_i32, %c0_i32_0 : i32, i32
  }
  func.func @transform_2(%arg0: i32) -> (i32, i32) {
    %c0_i32 = arith.constant 0 : i32
    %c0_i32_0 = arith.constant 0 : i32
    %c0_i32_1 = arith.constant 0 : i32
    return %c0_i32, %c0_i32_0 : i32, i32
  }
  func.func @transform_3(%arg0: i32) -> (i32, i32) {
    %c0_i32 = arith.constant 0 : i32
    %c0_i32_0 = arith.constant 0 : i32
    %c0_i32_1 = arith.constant 0 : i32
    return %c0_i32, %c0_i32_0 : i32, i32
  }
  func.func @transform_4(%arg0: i32) -> (i32, i32) {
    %c0_i32 = arith.constant 0 : i32
    %c0_i32_0 = arith.constant 0 : i32
    %c0_i32_1 = arith.constant 0 : i32
    return %c0_i32, %c0_i32_0 : i32, i32
  }
  func.func @transform_5(%arg0: i32) -> (i32, i32) {
    %c0_i32 = arith.constant 0 : i32
    %c0_i32_0 = arith.constant 0 : i32
    %c0_i32_1 = arith.constant 0 : i32
    return %c0_i32, %c0_i32_0 : i32, i32
  }
  func.func @transform_6(%arg0: i32) -> (i32, i32) {
    %c0_i32 = arith.constant 0 : i32
    %c0_i32_0 = arith.constant 0 : i32
    %c0_i32_1 = arith.constant 0 : i32
    return %c0_i32, %c0_i32_0 : i32, i32
  }
  func.func @transform_7(%arg0: i32) -> (i32, i32) {
    %c0_i32 = arith.constant 0 : i32
    %c0_i32_0 = arith.constant 0 : i32
    return %arg0, %c0_i32 : i32, i32
  }
}

module attributes {stable_mosaic.version = 11 : i64} {
  func.func @_policy_kernel(%arg0: i32, %arg1: memref<4x16xbf16, #tpu.memory_space<vmem>>, %arg2: memref<16x32xf32, #tpu.memory_space<vmem>>, %arg3: memref<1x32xf32, #tpu.memory_space<vmem>>, %arg4: memref<32x32xf32, #tpu.memory_space<vmem>>, %arg5: memref<1x32xf32, #tpu.memory_space<vmem>>, %arg6: memref<32x128xf32, #tpu.memory_space<vmem>>, %arg7: memref<1x128xf32, #tpu.memory_space<vmem>>, %arg8: memref<4x8xf32, #tpu.memory_space<vmem>>) attributes {dimension_semantics = [#tpu.dimension_semantics<parallel>], iteration_bounds = array<i64: 1>, scalar_prefetch = 0 : i64, scratch_operands = 0 : i64, tpu.core_type = #tpu.core_type<tc>, window_params = [{transform_indices = @transform_0, window_bounds = array<i64: 4, 16>}, {pipeline_mode = #tpu.pipeline_mode<synchronous>, transform_indices = @transform_1, window_bounds = array<i64: 16, 32>}, {pipeline_mode = #tpu.pipeline_mode<synchronous>, transform_indices = @transform_2, window_bounds = array<i64: 1, 32>}, {pipeline_mode = #tpu.pipeline_mode<synchronous>, transform_indices = @transform_3, window_bounds = array<i64: 32, 32>}, {pipeline_mode = #tpu.pipeline_mode<synchronous>, transform_indices = @transform_4, window_bounds = array<i64: 1, 32>}, {pipeline_mode = #tpu.pipeline_mode<synchronous>, transform_indices = @transform_5, window_bounds = array<i64: 32, 128>}, {pipeline_mode = #tpu.pipeline_mode<synchronous>, transform_indices = @transform_6, window_bounds = array<i64: 1, 128>}, {transform_indices = @transform_7, window_bounds = array<i64: 4, 8>}]} {
    %c0 = arith.constant 0 : index
    %c0_0 = arith.constant 0 : index
    %0 = vector.load %arg1[%c0, %c0_0] : memref<4x16xbf16, #tpu.memory_space<vmem>>, vector<4x16xbf16>
    %1 = arith.extf %0 : vector<4x16xbf16> to vector<4x16xf32>
    %c0_1 = arith.constant 0 : index
    %c0_2 = arith.constant 0 : index
    %2 = vector.load %arg2[%c0_1, %c0_2] : memref<16x32xf32, #tpu.memory_space<vmem>>, vector<16x32xf32>
    %c0_3 = arith.constant 0 : index
    %c0_4 = arith.constant 0 : index
    %3 = vector.load %arg3[%c0_3, %c0_4] : memref<1x32xf32, #tpu.memory_space<vmem>>, vector<1x32xf32>
    %cst = arith.constant dense<0.000000e+00> : vector<4x32xf32>
    %4 = tpu.matmul %1, %2, %cst {dimension_numbers = #tpu.dot_dimension_numbers<[1], [0], [0], [1], [0, 0, 1, 1], [], []>} : vector<4x16xf32>, vector<16x32xf32>, vector<4x32xf32> -> vector<4x32xf32>
    %5 = vector.broadcast %3 : vector<1x32xf32> to vector<4x32xf32>
    %6 = arith.addf %4, %5 : vector<4x32xf32>
    %cst_5 = arith.constant 0.000000e+00 : f32
    %7 = vector.broadcast %cst_5 : f32 to vector<4x32xf32>
    %8 = arith.maximumf %6, %7 : vector<4x32xf32>
    %c0_6 = arith.constant 0 : index
    %c0_7 = arith.constant 0 : index
    %9 = vector.load %arg4[%c0_6, %c0_7] : memref<32x32xf32, #tpu.memory_space<vmem>>, vector<32x32xf32>
    %c0_8 = arith.constant 0 : index
    %c0_9 = arith.constant 0 : index
    %10 = vector.load %arg5[%c0_8, %c0_9] : memref<1x32xf32, #tpu.memory_space<vmem>>, vector<1x32xf32>
    %cst_10 = arith.constant dense<0.000000e+00> : vector<4x32xf32>
    %11 = tpu.matmul %8, %9, %cst_10 {dimension_numbers = #tpu.dot_dimension_numbers<[1], [0], [0], [1], [0, 0, 1, 1], [], []>} : vector<4x32xf32>, vector<32x32xf32>, vector<4x32xf32> -> vector<4x32xf32>
    %12 = vector.broadcast %10 : vector<1x32xf32> to vector<4x32xf32>
    %13 = arith.addf %11, %12 : vector<4x32xf32>
    %cst_11 = arith.constant 0.000000e+00 : f32
    %14 = vector.broadcast %cst_11 : f32 to vector<4x32xf32>
    %15 = arith.maximumf %13, %14 : vector<4x32xf32>
    %c0_12 = arith.constant 0 : index
    %c0_13 = arith.constant 0 : index
    %16 = vector.load %arg6[%c0_12, %c0_13] : memref<32x128xf32, #tpu.memory_space<vmem>>, vector<32x128xf32>
    %c0_14 = arith.constant 0 : index
    %c0_15 = arith.constant 0 : index
    %17 = vector.load %arg7[%c0_14, %c0_15] : memref<1x128xf32, #tpu.memory_space<vmem>>, vector<1x128xf32>
    %cst_16 = arith.constant dense<0.000000e+00> : vector<4x128xf32>
    %18 = tpu.matmul %15, %16, %cst_16 {dimension_numbers = #tpu.dot_dimension_numbers<[1], [0], [0], [1], [0, 0, 1, 1], [], []>} : vector<4x32xf32>, vector<32x128xf32>, vector<4x128xf32> -> vector<4x128xf32>
    %19 = vector.broadcast %17 : vector<1x128xf32> to vector<4x128xf32>
    %20 = arith.addf %18, %19 : vector<4x128xf32>
    %cst_17 = arith.constant dense<0xFF800000> : vector<4xf32>
    %21 = vector.multi_reduction <maximumf>, %20, %cst_17 [1] : vector<4x128xf32> to vector<4xf32>
    %22 = vector.shape_cast %21 : vector<4xf32> to vector<4x1xf32>
    %23 = vector.broadcast %22 : vector<4x1xf32> to vector<4x128xf32>
    %24 = arith.subf %20, %23 : vector<4x128xf32>
    %25 = math.exp %24 : vector<4x128xf32>
    %cst_18 = arith.constant dense<0.000000e+00> : vector<4xf32>
    %26 = vector.multi_reduction <add>, %25, %cst_18 [1] : vector<4x128xf32> to vector<4xf32>
    %27 = vector.shape_cast %26 : vector<4xf32> to vector<4x1xf32>
    %28 = tpu.reciprocal %27 : vector<4x1xf32> -> vector<4x1xf32>
    %29 = vector.broadcast %28 : vector<4x1xf32> to vector<4x128xf32>
    %30 = arith.mulf %25, %29 : vector<4x128xf32>
    %31 = vector.extract_strided_slice %30 {offsets = [0, 0], sizes = [4, 8], strides = [1, 1]} : vector<4x128xf32> to vector<4x8xf32>
    %c0_19 = arith.constant 0 : index
    %c0_20 = arith.constant 0 : index
    %32 = vector.load %arg8[%c0_19, %c0_20] : memref<4x8xf32, #tpu.memory_space<vmem>>, vector<4x8xf32>
    tpu.vector_store %arg8[%c0_19, %c0_20], %31 {strides = array<i32>} : memref<4x8xf32, #tpu.memory_space<vmem>>, vector<4x8xf32>,
    return
  }
  func.func @transform_0(%arg0: i32) -> (i32, i32) {
    %c0_i32 = arith.constant 0 : i32
    %c0_i32_0 = arith.constant 0 : i32
    return %arg0, %c0_i32 : i32, i32
  }
  func.func @transform_1(%arg0: i32) -> (i32, i32) {
    %c0_i32 = arith.constant 0 : i32
    %c0_i32_0 = arith.constant 0 : i32
    %c0_i32_1 = arith.constant 0 : i32
    return %c0_i32, %c0_i32_0 : i32, i32
  }
  func.func @transform_2(%arg0: i32) -> (i32, i32) {
    %c0_i32 = arith.constant 0 : i32
    %c0_i32_0 = arith.constant 0 : i32
    %c0_i32_1 = arith.constant 0 : i32
    return %c0_i32, %c0_i32_0 : i32, i32
  }
  func.func @transform_3(%arg0: i32) -> (i32, i32) {
    %c0_i32 = arith.constant 0 : i32
    %c0_i32_0 = arith.constant 0 : i32
    %c0_i32_1 = arith.constant 0 : i32
    return %c0_i32, %c0_i32_0 : i32, i32
  }
  func.func @transform_4(%arg0: i32) -> (i32, i32) {
    %c0_i32 = arith.constant 0 : i32
    %c0_i32_0 = arith.constant 0 : i32
    %c0_i32_1 = arith.constant 0 : i32
    return %c0_i32, %c0_i32_0 : i32, i32
  }
  func.func @transform_5(%arg0: i32) -> (i32, i32) {
    %c0_i32 = arith.constant 0 : i32
    %c0_i32_0 = arith.constant 0 : i32
    %c0_i32_1 = arith.constant 0 : i32
    return %c0_i32, %c0_i32_0 : i32, i32
  }
  func.func @transform_6(%arg0: i32) -> (i32, i32) {
    %c0_i32 = arith.constant 0 : i32
    %c0_i32_0 = arith.constant 0 : i32
    %c0_i32_1 = arith.constant 0 : i32
    return %c0_i32, %c0_i32_0 : i32, i32
  }
  func.func @transform_7(%arg0: i32) -> (i32, i32) {
    %c0_i32 = arith.constant 0 : i32
    %c0_i32_0 = arith.constant 0 : i32
    return %arg0, %c0_i32 : i32, i32
  }
}

</mosaic_0001>

<bundles_post_ra>
// kernel: tpu_custom_call.1
= control target key start
LH: loop header
LB: loop body
LE: loop exit
PB: predicated region body
PF: predicated region fallthrough
CT: control target
= control target key end

     0   :  { %12 = vsyncpa [#allocation3], 0  ;;  %s693_s0 = inlined_call_operand.hbm [shape: bf16[4,16], index: 0, kind: input, shape index: {}]   ;;  %s694_s1 = inlined_call_operand.hbm [shape: f32[16,32], index: 1, kind: input, shape index: {}]   ;;  %s695_s2 = inlined_call_operand.vmem [shape: f32[1,32], index: 2, kind: input, shape index: {}]   ;;  %s696_s3 = inlined_call_operand.hbm [shape: f32[32,32], index: 3, kind: input, shape index: {}]   ;;  %s697_s4 = inlined_call_operand.vmem [shape: f32[1,32], index: 4, kind: input, shape index: {}]   ;;  %s698_s5 = inlined_call_operand.hbm [shape: f32[32,128], index: 5, kind: input, shape index: {}]   ;;  %s699_s6 = inlined_call_operand.vmem [shape: f32[1,128], index: 6, kind: input, shape index: {}]   ;;  %s700_s7 = inlined_call_operand.hbm [shape: f32[4,8], index: 7, kind: output, shape index: {}]  }
   0x1   :  { %13 = vsyncpa [#allocation6], 0 }
   0x2   :  { %14 = vsyncpa [#allocation9], 0 }
   0x3   :  { %15 = vsyncpa [#allocation4], 0  ;;  %s562_s24 = smov [#allocation5]   ;;  %s444_s28 = scalar_lea.hbm %s694_s1, 256 }
   0x4   :  { %s31_s25 = sshll.u32 %s562_s24, 4  ;;  %p445_p0 = scmp.ne.s32.totalorder %s694_s1, %s444_s28  ;;  %s32_s25 = int_to_ptr.vmem [resolvable:$true] %s31_s25 }
   0x5   :  { %p448_p1 = scmp.lt.u32.totalorder %s444_s28, %s694_s1 }
   0x7   :  { %p450_p2 = pnand %p448_p1, %p445_p0 }
   0x9   :  { %453 = shalt.err (!%p450_p2)
}
   0xa   :  { %s454_s10 = scalar_lea.vmem %s32_s25, 256  ;;  %p459_p4 = scmp.lt.s32.totalorder %s32_s25, %s32_s25 }
   0xb   :  { %p455_p3 = scmp.ne.s32.totalorder %s32_s25, %s454_s10  ;;  %p460_p5 = scmp.lt.s32.totalorder %s454_s10, %s454_s10 }
   0xd   :  { %p461_p6 = por %p460_p5, %p459_p4 }
   0xf   :  { %p462_p7 = pnand %p461_p6, %p455_p3 }
  0x11   :  { %465 = shalt.err (!%p462_p7)
}
  0x12   :  { %s563_s11 = smov 128   ;;  %s564_s12 = smov 8  }
  0x13   :  { %37 = dma.hbm_to_vmem [thread:$0]  %s694_s1, 256, %s32_s25, [#allocation6], %s563_s11, %s563_s11, %s564_s12  }
  0x14   :  { %s565_s15 = smov [#allocation2]   ;;  %s566_s17 = smov [#allocation7]  }
  0x15   :  { %s22_s16 = sshll.u32 %s565_s15, 4  ;;  %s45_s18 = sshll.u32 %s566_s17, 4  ;;  %s23_s16 = int_to_ptr.vmem [resolvable:$true] %s22_s16  ;;  %s46_s18 = int_to_ptr.vmem [resolvable:$true] %s45_s18 }
  0x16   :  { %s466_s21 = scalar_lea.hbm %s693_s0, 32 }
  0x17   :  { %p467_p8 = scmp.ne.s32.totalorder %s693_s0, %s466_s21  ;;  %p470_p9 = scmp.lt.u32.totalorder %s466_s21, %s693_s0 }
  0x19   :  { %p472_p10 = pnand %p470_p9, %p467_p8 }
  0x1b   :  { %475 = shalt.err (!%p472_p10)
}
  0x1c   :  { %s476_s1 = scalar_lea.vmem %s23_s16, 32  ;;  %p481_p12 = scmp.lt.s32.totalorder %s23_s16, %s23_s16 }
  0x1d   :  { %p477_p11 = scmp.ne.s32.totalorder %s23_s16, %s476_s1  ;;  %p482_p13 = scmp.lt.s32.totalorder %s476_s1, %s476_s1 }
  0x1f   :  { %p483_p0 = por %p482_p13, %p481_p12 }
  0x21   :  { %p484_p1 = pnand %p483_p0, %p477_p11 }
  0x23   :  { %487 = shalt.err (!%p484_p1)
}
  0x24   :  { %25 = dma.hbm_to_vmem [thread:$0]  %s693_s0, 32, %s23_s16, [#allocation3]  }
  0x25   :  { %s488_s30 = scalar_lea.hbm %s696_s3, 512 }
  0x26   :  { %p489_p2 = scmp.ne.s32.totalorder %s696_s3, %s488_s30  ;;  %p492_p3 = scmp.lt.u32.totalorder %s488_s30, %s696_s3 }
  0x28   :  { %p494_p4 = pnand %p492_p3, %p489_p2 }
  0x2a   :  { %497 = shalt.err (!%p494_p4)
}
  0x2b   :  { %s498_s14 = scalar_lea.vmem %s46_s18, 512  ;;  %p503_p6 = scmp.lt.s32.totalorder %s46_s18, %s46_s18 }
  0x2c   :  { %p499_p5 = scmp.ne.s32.totalorder %s46_s18, %s498_s14  ;;  %p504_p7 = scmp.lt.s32.totalorder %s498_s14, %s498_s14 }
  0x2e   :  { %p505_p8 = por %p504_p7, %p503_p6 }
  0x30   :  { %p506_p9 = pnand %p505_p8, %p499_p5 }
  0x32   :  { %509 = shalt.err (!%p506_p9)
}
  0x33   :  { %51 = dma.hbm_to_vmem [thread:$0]  %s696_s3, 512, %s46_s18, [#allocation6], %s563_s11, %s563_s11, %s564_s12  }
  0x34   :  { %s567_s16 = smov [#allocation8]   ;;  %s510_s21 = scalar_lea.hbm %s698_s5, 512 }
  0x35   :  { %s59_s17 = sshll.u32 %s567_s16, 4  ;;  %p511_p10 = scmp.ne.s32.totalorder %s698_s5, %s510_s21  ;;  %s60_s17 = int_to_ptr.vmem [resolvable:$true] %s59_s17 }
  0x36   :  { %p514_p11 = scmp.lt.u32.totalorder %s510_s21, %s698_s5 }
  0x38   :  { %p516_p12 = pnand %p514_p11, %p511_p10 }
  0x3a   :  { %519 = shalt.err (!%p516_p12)
}
  0x3b   :  { %s520_s1 = scalar_lea.vmem %s60_s17, 512  ;;  %p525_p0 = scmp.lt.s32.totalorder %s60_s17, %s60_s17 }
  0x3c   :  { %p521_p13 = scmp.ne.s32.totalorder %s60_s17, %s520_s1  ;;  %p526_p1 = scmp.lt.s32.totalorder %s520_s1, %s520_s1 }
  0x3e   :  { %p527_p2 = por %p526_p1, %p525_p0 }
  0x40   :  { %p528_p3 = pnand %p527_p2, %p521_p13 }
  0x42   :  { %531 = shalt.err (!%p528_p3)
}
  0x43   :  { %65 = dma.hbm_to_vmem [thread:$0]  %s698_s5, 512, %s60_s17, [#allocation9], %s563_s11, %s563_s11, %s564_s12  }
  0x44   :  { %554 = dma.done.wait [#allocation3], 32  }
  0x45   :  { %555 = vsyncadd [#allocation3], 4294967264 }
  0x46   :  { %556 = dma.done.wait [#allocation6], 768  }
  0x47   :  { %557 = vsyncadd [#allocation6], 4294966528 }
  0x48   :  { %558 = dma.done.wait [#allocation9], 512  }
  0x49   :  { %559 = vsyncadd [#allocation9], 4294966784  ;;  %v568_v0 = vmov 0.0|0.0   ;;  %vm569_vm0 = vmmov 0   ;;  %v570_v1 = vmov 0.0   ;;  %v82_v2 = vld [vmem:[#allocation5] sm:$0xff] }
  0x4a   :  { %415 = vmatprep.subr.bf16.mxu0 %v568_v0  ;;  %390 = vmatprep.mubr.msk.f32.mxu0 %vm569_vm0, %v570_v1  ;;  %v83_v3 = vld [vmem:[#allocation5 + $0x8] sm:$0xff]  ;;  %v80_v4 = vld [vmem:[#allocation2] sm:$0x3]  ;;  %v166_v6 = vld [vmem:[#allocation7] sm:$0xff]  ;;  %vm91_vm1 = vcmask 130048   ;;  %vm177_vm2 = vcmask 261120  }
  0x4b   :  { %418 = vmatprep.subr.bf16.mxu1 %v568_v0  ;;  %401 = vmatprep.mubr.msk.f32.mxu1 %vm569_vm0, %v570_v1  ;;  %v416_v5 = vpack.c.bf16 %v83_v3, %v82_v2  ;;  %v167_v7 = vld [vmem:[#allocation7 + $0x8] sm:$0xff]  ;;  %v81_v8 = vunpack.c.l.bf16 %v80_v4  ;;  %v168_v10 = vld [vmem:[#allocation7 + $0x10] sm:$0xff]  ;;  %v169_v11 = vld [vmem:[#allocation7 + $0x18] sm:$0xff]  ;;  %vm336_vm3 = vcmask 1043456   ;;  %vm348_vm4 = vcmask 60416  }
  0x4c   :  { %v419_v9 = vpack.c.bf16 %v167_v7, %v166_v6  ;;  %v422_v12 = vpack.c.bf16 %v169_v11, %v168_v10  ;;  %v252_v13 = vld [vmem:[#allocation8] sm:$0xff]  ;;  %v253_v14 = vld [vmem:[#allocation8 + $0x8] sm:$0xff]  ;;  %v254_v21 = vld [vmem:[#allocation8 + $0x10] sm:$0xff] }
  0x4d   :  { %417 = vmatpush3.bf16.msra.mxu0 %v416_v5  ;;  %v425_v15 = vpack.c.bf16 %v253_v14, %v252_v13  ;;  %v367_v16 = vld [vmem:[%s695_s2] ss:$0 sm:$0xff]  ;;  %v255_v22 = vld [vmem:[#allocation8 + $0x18] sm:$0xff] }
  0x4e   :  { %420 = vmatpush3.bf16.msra.mxu1 %v419_v9  ;;  %424 = vmatprep.subr.bf16.mxu0 %v568_v0  ;;  %v428_v23 = vpack.c.bf16 %v255_v22, %v254_v21  ;;  %v369_v24 = vld [vmem:[%s697_s4] ss:$0 sm:$0xff]  ;;  %s571_s4 = smov [#allocation10]  }
  0x4f   :  { %421 = vmatprep.subr.bf16.mxu1 %v568_v0  ;;  %v371_v29 = vld [vmem:[%s699_s6] ss:$0 sm:$0xff]  ;;  %s356_s28 = sshll.u32 %s571_s4, 4  ;;  %s357_s28 = int_to_ptr.vmem [resolvable:$true] %s356_s28 }
  0x50   :  { %391 = vmatmul.mubr.msk.f32.vlgmr.msra.gmra.mrb[0].mxu0 %vm91_vm1, %v81_v8  ;;  %s532_s6 = scalar_lea.vmem %s357_s28, 64  ;;  %p537_p5 = scmp.lt.s32.totalorder %s357_s28, %s357_s28 }
  0x51   :  { %412 = vmatprep.mubr.msk.f32.mxu0 %vm569_vm0, %v570_v1  ;;  %426 = vmatpush3.bf16.msra.mxu0 %v425_v15  ;;  %p533_p4 = scmp.ne.s32.totalorder %s357_s28, %s532_s6  ;;  %p538_p6 = scmp.lt.s32.totalorder %s532_s6, %s532_s6 }
  0x52   :  { %423 = vmatpush3.bf16.msra.mxu1 %v422_v12  ;;  %427 = vmatprep.subr.bf16.mxu0 %v568_v0 }
  0x53   :  { %p539_p7 = por %p538_p6, %p537_p5 }
  0x55   :  { %429 = vmatpush3.bf16.msra.mxu0 %v428_v23  ;;  %p540_p8 = pnand %p539_p7, %p533_p4 }
 0x123   :  { %v161_v17 = vpop.f32.mrb[0].mxu0 }
 0x124   :  { %v162_v18 = vadd.f32 %v367_v16, %v161_v17  ;;  %v392_v19 = vpop.f32.mrb[1].mxu0 }
 0x126   :  { %v165_v20 = vmax.f32 %v162_v18, 0.0 }
 0x128   :  { %402 = vmatmul.mubr.msk.f32.vlgmr.msra.gmra.mrb[0].mxu1 %vm177_vm2, %v165_v20 }
 0x1fb   :  { %v247_v25 = vpop.f32.mrb[0].mxu1 }
 0x1fc   :  { %v248_v26 = vadd.f32 %v369_v24, %v247_v25  ;;  %v403_v27 = vpop.f32.mrb[1].mxu1 }
 0x1fe   :  { %v251_v28 = vmax.f32 %v248_v26, 0.0 }
 0x200   :  { %413 = vmatmul.mubr.msk.f32.vlgmr.msra.gmra.mrb[2].mxu0 %vm177_vm2, %v251_v28 }
 0x2d3   :  { %v332_v30 = vpop.f32.mrb[2].mxu0 }
 0x2d4   :  { %v333_v31 = vadd.f32 %v371_v29, %v332_v30  ;;  %v414_v32 = vpop.f32.mrb[3].mxu0 }
 0x2d6   :  { %v337_v33 = vsel %vm336_vm3, %v333_v31, -inf }
 0x2d7   :  { %338 = vmax.xlane.f32.xlu0 %v337_v33 }
 0x364   :  { %v339_v34 = vpop.xlane.xlu0 %338 }
 0x365   :  { %v340_v35 = vsub.f32 %v333_v31, %v339_v34 }
 0x367   :  { %v341_v36 = vmul.f32 1.442695, %v340_v35 }
 0x369   :  { %440 = vpow2.f32 %v341_v36 }
 0x373   :  { %v441_v37 = vpop.eup %440 }
 0x374   :  { %v343_v38 = vsel %vm336_vm3, %v441_v37, 0.0 }
 0x375   :  { %344 = vadd.xlane.f32.xlu0 %v343_v38 }
 0x402   :  { %v345_v39 = vpop.xlane.xlu0 %344 }
 0x403   :  { %442 = vrcp.f32 %v345_v39 }
 0x40d   :  { %v443_v40 = vpop.eup %442 }
 0x40e   :  { %v347_v41 = vmul.f32 %v443_v40, %v441_v37 }
 0x410   :  { %349 = vst.msk [vmem:[#allocation10] sm:$0xf] %vm348_vm4, %v347_v41 }
 0x411   :  { %543 = shalt.err (!%p540_p8)
}
 0x412   :  { %s544_s8 = scalar_lea.hbm %s700_s7, 64 }
 0x413   :  { %p545_p9 = scmp.ne.s32.totalorder %s700_s7, %s544_s8  ;;  %p548_p10 = scmp.lt.u32.totalorder %s544_s8, %s700_s7 }
 0x415   :  { %p550_p11 = pnand %p548_p10, %p545_p9 }
 0x417   :  { %553 = shalt.err (!%p550_p11)
}
 0x418   :  { %359 = dma.vmem_to_hbm [thread:$0]  %s357_s28, 64, %s700_s7, [#allocation4]  }
 0x419   :  { %560 = dma.done.wait [#allocation4], 64  }
 0x41a   :  { %561 = vsyncadd [#allocation4], 4294967232 }
 0x41b   :  { %363 = vsyncpa [#allocation3], 1 }
 0x41c   :  { %364 = vsyncpa [#allocation6], 1 }
 0x41d   :  { %365 = vsyncpa [#allocation9], 1 }
 0x41e   :  { %366 = vsyncpa [#allocation4], 1 }

// kernel: tpu_custom_call.1
= control target key start
LH: loop header
LB: loop body
LE: loop exit
PB: predicated region body
PF: predicated region fallthrough
CT: control target
= control target key end

     0   :  { %12 = vsyncpa [#allocation3], 0  ;;  %s693_s0 = inlined_call_operand.hbm [shape: bf16[4,16], index: 0, kind: input, shape index: {}]   ;;  %s694_s1 = inlined_call_operand.hbm [shape: f32[16,32], index: 1, kind: input, shape index: {}]   ;;  %s695_s2 = inlined_call_operand.vmem [shape: f32[1,32], index: 2, kind: input, shape index: {}]   ;;  %s696_s3 = inlined_call_operand.hbm [shape: f32[32,32], index: 3, kind: input, shape index: {}]   ;;  %s697_s4 = inlined_call_operand.vmem [shape: f32[1,32], index: 4, kind: input, shape index: {}]   ;;  %s698_s5 = inlined_call_operand.hbm [shape: f32[32,128], index: 5, kind: input, shape index: {}]   ;;  %s699_s6 = inlined_call_operand.vmem [shape: f32[1,128], index: 6, kind: input, shape index: {}]   ;;  %s700_s7 = inlined_call_operand.hbm [shape: f32[4,8], index: 7, kind: output, shape index: {}]  }
   0x1   :  { %13 = vsyncpa [#allocation6], 0 }
   0x2   :  { %14 = vsyncpa [#allocation9], 0 }
   0x3   :  { %15 = vsyncpa [#allocation4], 0  ;;  %s562_s24 = smov [#allocation5]   ;;  %s444_s28 = scalar_lea.hbm %s694_s1, 256 }
   0x4   :  { %s31_s25 = sshll.u32 %s562_s24, 4  ;;  %p445_p0 = scmp.ne.s32.totalorder %s694_s1, %s444_s28  ;;  %s32_s25 = int_to_ptr.vmem [resolvable:$true] %s31_s25 }
   0x5   :  { %p448_p1 = scmp.lt.u32.totalorder %s444_s28, %s694_s1 }
   0x7   :  { %p450_p2 = pnand %p448_p1, %p445_p0 }
   0x9   :  { %453 = shalt.err (!%p450_p2)
}
   0xa   :  { %s454_s10 = scalar_lea.vmem %s32_s25, 256  ;;  %p459_p4 = scmp.lt.s32.totalorder %s32_s25, %s32_s25 }
   0xb   :  { %p455_p3 = scmp.ne.s32.totalorder %s32_s25, %s454_s10  ;;  %p460_p5 = scmp.lt.s32.totalorder %s454_s10, %s454_s10 }
   0xd   :  { %p461_p6 = por %p460_p5, %p459_p4 }
   0xf   :  { %p462_p7 = pnand %p461_p6, %p455_p3 }
  0x11   :  { %465 = shalt.err (!%p462_p7)
}
  0x12   :  { %s563_s11 = smov 128   ;;  %s564_s12 = smov 8  }
  0x13   :  { %37 = dma.hbm_to_vmem [thread:$0]  %s694_s1, 256, %s32_s25, [#allocation6], %s563_s11, %s563_s11, %s564_s12  }
  0x14   :  { %s565_s15 = smov [#allocation2]   ;;  %s566_s17 = smov [#allocation7]  }
  0x15   :  { %s22_s16 = sshll.u32 %s565_s15, 4  ;;  %s45_s18 = sshll.u32 %s566_s17, 4  ;;  %s23_s16 = int_to_ptr.vmem [resolvable:$true] %s22_s16  ;;  %s46_s18 = int_to_ptr.vmem [resolvable:$true] %s45_s18 }
  0x16   :  { %s466_s21 = scalar_lea.hbm %s693_s0, 32 }
  0x17   :  { %p467_p8 = scmp.ne.s32.totalorder %s693_s0, %s466_s21  ;;  %p470_p9 = scmp.lt.u32.totalorder %s466_s21, %s693_s0 }
  0x19   :  { %p472_p10 = pnand %p470_p9, %p467_p8 }
  0x1b   :  { %475 = shalt.err (!%p472_p10)
}
  0x1c   :  { %s476_s1 = scalar_lea.vmem %s23_s16, 32  ;;  %p481_p12 = scmp.lt.s32.totalorder %s23_s16, %s23_s16 }
  0x1d   :  { %p477_p11 = scmp.ne.s32.totalorder %s23_s16, %s476_s1  ;;  %p482_p13 = scmp.lt.s32.totalorder %s476_s1, %s476_s1 }
  0x1f   :  { %p483_p0 = por %p482_p13, %p481_p12 }
  0x21   :  { %p484_p1 = pnand %p483_p0, %p477_p11 }
  0x23   :  { %487 = shalt.err (!%p484_p1)
}
  0x24   :  { %25 = dma.hbm_to_vmem [thread:$0]  %s693_s0, 32, %s23_s16, [#allocation3]  }
  0x25   :  { %s488_s30 = scalar_lea.hbm %s696_s3, 512 }
  0x26   :  { %p489_p2 = scmp.ne.s32.totalorder %s696_s3, %s488_s30  ;;  %p492_p3 = scmp.lt.u32.totalorder %s488_s30, %s696_s3 }
  0x28   :  { %p494_p4 = pnand %p492_p3, %p489_p2 }
  0x2a   :  { %497 = shalt.err (!%p494_p4)
}
  0x2b   :  { %s498_s14 = scalar_lea.vmem %s46_s18, 512  ;;  %p503_p6 = scmp.lt.s32.totalorder %s46_s18, %s46_s18 }
  0x2c   :  { %p499_p5 = scmp.ne.s32.totalorder %s46_s18, %s498_s14  ;;  %p504_p7 = scmp.lt.s32.totalorder %s498_s14, %s498_s14 }
  0x2e   :  { %p505_p8 = por %p504_p7, %p503_p6 }
  0x30   :  { %p506_p9 = pnand %p505_p8, %p499_p5 }
  0x32   :  { %509 = shalt.err (!%p506_p9)
}
  0x33   :  { %51 = dma.hbm_to_vmem [thread:$0]  %s696_s3, 512, %s46_s18, [#allocation6], %s563_s11, %s563_s11, %s564_s12  }
  0x34   :  { %s567_s16 = smov [#allocation8]   ;;  %s510_s21 = scalar_lea.hbm %s698_s5, 512 }
  0x35   :  { %s59_s17 = sshll.u32 %s567_s16, 4  ;;  %p511_p10 = scmp.ne.s32.totalorder %s698_s5, %s510_s21  ;;  %s60_s17 = int_to_ptr.vmem [resolvable:$true] %s59_s17 }
  0x36   :  { %p514_p11 = scmp.lt.u32.totalorder %s510_s21, %s698_s5 }
  0x38   :  { %p516_p12 = pnand %p514_p11, %p511_p10 }
  0x3a   :  { %519 = shalt.err (!%p516_p12)
}
  0x3b   :  { %s520_s1 = scalar_lea.vmem %s60_s17, 512  ;;  %p525_p0 = scmp.lt.s32.totalorder %s60_s17, %s60_s17 }
  0x3c   :  { %p521_p13 = scmp.ne.s32.totalorder %s60_s17, %s520_s1  ;;  %p526_p1 = scmp.lt.s32.totalorder %s520_s1, %s520_s1 }
  0x3e   :  { %p527_p2 = por %p526_p1, %p525_p0 }
  0x40   :  { %p528_p3 = pnand %p527_p2, %p521_p13 }
  0x42   :  { %531 = shalt.err (!%p528_p3)
}
  0x43   :  { %65 = dma.hbm_to_vmem [thread:$0]  %s698_s5, 512, %s60_s17, [#allocation9], %s563_s11, %s563_s11, %s564_s12  }
  0x44   :  { %554 = dma.done.wait [#allocation3], 32  }
  0x45   :  { %555 = vsyncadd [#allocation3], 4294967264 }
  0x46   :  { %556 = dma.done.wait [#allocation6], 768  }
  0x47   :  { %557 = vsyncadd [#allocation6], 4294966528 }
  0x48   :  { %558 = dma.done.wait [#allocation9], 512  }
  0x49   :  { %559 = vsyncadd [#allocation9], 4294966784  ;;  %v568_v0 = vmov 0.0|0.0   ;;  %vm569_vm0 = vmmov 0   ;;  %v570_v1 = vmov 0.0   ;;  %v82_v2 = vld [vmem:[#allocation5] sm:$0xff] }
  0x4a   :  { %415 = vmatprep.subr.bf16.mxu0 %v568_v0  ;;  %390 = vmatprep.mubr.msk.f32.mxu0 %vm569_vm0, %v570_v1  ;;  %v83_v3 = vld [vmem:[#allocation5 + $0x8] sm:$0xff]  ;;  %v80_v4 = vld [vmem:[#allocation2] sm:$0x3]  ;;  %v166_v6 = vld [vmem:[#allocation7] sm:$0xff]  ;;  %vm91_vm1 = vcmask 130048   ;;  %vm177_vm2 = vcmask 261120  }
  0x4b   :  { %418 = vmatprep.subr.bf16.mxu1 %v568_v0  ;;  %401 = vmatprep.mubr.msk.f32.mxu1 %vm569_vm0, %v570_v1  ;;  %v416_v5 = vpack.c.bf16 %v83_v3, %v82_v2  ;;  %v167_v7 = vld [vmem:[#allocation7 + $0x8] sm:$0xff]  ;;  %v81_v8 = vunpack.c.l.bf16 %v80_v4  ;;  %v168_v10 = vld [vmem:[#allocation7 + $0x10] sm:$0xff]  ;;  %v169_v11 = vld [vmem:[#allocation7 + $0x18] sm:$0xff]  ;;  %vm336_vm3 = vcmask 1043456   ;;  %vm348_vm4 = vcmask 60416  }
  0x4c   :  { %v419_v9 = vpack.c.bf16 %v167_v7, %v166_v6  ;;  %v422_v12 = vpack.c.bf16 %v169_v11, %v168_v10  ;;  %v252_v13 = vld [vmem:[#allocation8] sm:$0xff]  ;;  %v253_v14 = vld [vmem:[#allocation8 + $0x8] sm:$0xff]  ;;  %v254_v21 = vld [vmem:[#allocation8 + $0x10] sm:$0xff] }
  0x4d   :  { %417 = vmatpush3.bf16.msra.mxu0 %v416_v5  ;;  %v425_v15 = vpack.c.bf16 %v253_v14, %v252_v13  ;;  %v367_v16 = vld [vmem:[%s695_s2] ss:$0 sm:$0xff]  ;;  %v255_v22 = vld [vmem:[#allocation8 + $0x18] sm:$0xff] }
  0x4e   :  { %420 = vmatpush3.bf16.msra.mxu1 %v419_v9  ;;  %424 = vmatprep.subr.bf16.mxu0 %v568_v0  ;;  %v428_v23 = vpack.c.bf16 %v255_v22, %v254_v21  ;;  %v369_v24 = vld [vmem:[%s697_s4] ss:$0 sm:$0xff]  ;;  %s571_s4 = smov [#allocation10]  }
  0x4f   :  { %421 = vmatprep.subr.bf16.mxu1 %v568_v0  ;;  %v371_v29 = vld [vmem:[%s699_s6] ss:$0 sm:$0xff]  ;;  %s356_s28 = sshll.u32 %s571_s4, 4  ;;  %s357_s28 = int_to_ptr.vmem [resolvable:$true] %s356_s28 }
  0x50   :  { %391 = vmatmul.mubr.msk.f32.vlgmr.msra.gmra.mrb[0].mxu0 %vm91_vm1, %v81_v8  ;;  %s532_s6 = scalar_lea.vmem %s357_s28, 64  ;;  %p537_p5 = scmp.lt.s32.totalorder %s357_s28, %s357_s28 }
  0x51   :  { %412 = vmatprep.mubr.msk.f32.mxu0 %vm569_vm0, %v570_v1  ;;  %426 = vmatpush3.bf16.msra.mxu0 %v425_v15  ;;  %p533_p4 = scmp.ne.s32.totalorder %s357_s28, %s532_s6  ;;  %p538_p6 = scmp.lt.s32.totalorder %s532_s6, %s532_s6 }
  0x52   :  { %423 = vmatpush3.bf16.msra.mxu1 %v422_v12  ;;  %427 = vmatprep.subr.bf16.mxu0 %v568_v0 }
  0x53   :  { %p539_p7 = por %p538_p6, %p537_p5 }
  0x55   :  { %429 = vmatpush3.bf16.msra.mxu0 %v428_v23  ;;  %p540_p8 = pnand %p539_p7, %p533_p4 }
 0x123   :  { %v161_v17 = vpop.f32.mrb[0].mxu0 }
 0x124   :  { %v162_v18 = vadd.f32 %v367_v16, %v161_v17  ;;  %v392_v19 = vpop.f32.mrb[1].mxu0 }
 0x126   :  { %v165_v20 = vmax.f32 %v162_v18, 0.0 }
 0x128   :  { %402 = vmatmul.mubr.msk.f32.vlgmr.msra.gmra.mrb[0].mxu1 %vm177_vm2, %v165_v20 }
 0x1fb   :  { %v247_v25 = vpop.f32.mrb[0].mxu1 }
 0x1fc   :  { %v248_v26 = vadd.f32 %v369_v24, %v247_v25  ;;  %v403_v27 = vpop.f32.mrb[1].mxu1 }
 0x1fe   :  { %v251_v28 = vmax.f32 %v248_v26, 0.0 }
 0x200   :  { %413 = vmatmul.mubr.msk.f32.vlgmr.msra.gmra.mrb[2].mxu0 %vm177_vm2, %v251_v28 }
 0x2d3   :  { %v332_v30 = vpop.f32.mrb[2].mxu0 }
 0x2d4   :  { %v333_v31 = vadd.f32 %v371_v29, %v332_v30  ;;  %v414_v32 = vpop.f32.mrb[3].mxu0 }
 0x2d6   :  { %v337_v33 = vsel %vm336_vm3, %v333_v31, -inf }
 0x2d7   :  { %338 = vmax.xlane.f32.xlu0 %v337_v33 }
 0x364   :  { %v339_v34 = vpop.xlane.xlu0 %338 }
 0x365   :  { %v340_v35 = vsub.f32 %v333_v31, %v339_v34 }
 0x367   :  { %v341_v36 = vmul.f32 1.442695, %v340_v35 }
 0x369   :  { %440 = vpow2.f32 %v341_v36 }
 0x373   :  { %v441_v37 = vpop.eup %440 }
 0x374   :  { %v343_v38 = vsel %vm336_vm3, %v441_v37, 0.0 }
 0x375   :  { %344 = vadd.xlane.f32.xlu0 %v343_v38 }
 0x402   :  { %v345_v39 = vpop.xlane.xlu0 %344 }
 0x403   :  { %442 = vrcp.f32 %v345_v39 }
 0x40d   :  { %v443_v40 = vpop.eup %442 }
 0x40e   :  { %v347_v41 = vmul.f32 %v443_v40, %v441_v37 }
 0x410   :  { %349 = vst.msk [vmem:[#allocation10] sm:$0xf] %vm348_vm4, %v347_v41 }
 0x411   :  { %543 = shalt.err (!%p540_p8)
}
 0x412   :  { %s544_s8 = scalar_lea.hbm %s700_s7, 64 }
 0x413   :  { %p545_p9 = scmp.ne.s32.totalorder %s700_s7, %s544_s8  ;;  %p548_p10 = scmp.lt.u32.totalorder %s544_s8, %s700_s7 }
 0x415   :  { %p550_p11 = pnand %p548_p10, %p545_p9 }
 0x417   :  { %553 = shalt.err (!%p550_p11)
}
 0x418   :  { %359 = dma.vmem_to_hbm [thread:$0]  %s357_s28, 64, %s700_s7, [#allocation4]  }
 0x419   :  { %560 = dma.done.wait [#allocation4], 64  }
 0x41a   :  { %561 = vsyncadd [#allocation4], 4294967232 }
 0x41b   :  { %363 = vsyncpa [#allocation3], 1 }
 0x41c   :  { %364 = vsyncpa [#allocation6], 1 }
 0x41d   :  { %365 = vsyncpa [#allocation9], 1 }
 0x41e   :  { %366 = vsyncpa [#allocation4], 1 }

</bundles_post_ra>
